<compile_context>
chip_gen: v5e
topology: v5e:2x2
jax: 0.10.0
libtpu: 0.0.40
codegen_flags: <defaults>
</compile_context>

<pallas_src>
import functools

import jax
import jax.numpy as jnp
from jax import lax
from jax.experimental import pallas as pl
from jax.experimental.pallas import tpu as pltpu


def _round_up(x, m):
    return ((x + m - 1) // m) * m


def _cdiv(a, b):
    return (a + b - 1) // b


def _lane_pad(d):
    # Lane-dense padding: 128 minimum; 256-aligned beyond that (256-wide MXU).
    return 128 if d <= 128 else _round_up(d, 256)


@functools.lru_cache(maxsize=1)
def _physical_vmem_bytes():
    try:
        v = int(pltpu.get_tpu_info().vmem_capacity_bytes)
    except Exception:
        v = 64 * 1024 * 1024            # conservative (v7x per-TC VMEM)
    return max(32 * 1024 * 1024, min(v, 128 * 1024 * 1024))


# --------------------------------------------------------------------------
# Kernels
# --------------------------------------------------------------------------
def _ffn_resident_kernel(x_ref, w1_ref, b1_ref, w2_ref, b2_ref, o_ref):
    # x_ref:  (tm, dm_p)                        row tile
    # w1_ref: (n_chunks, dm_p, tf)              VMEM-resident (constant index)
    # b1_ref: (n_chunks, 1, tf)
    # w2_ref: (n_chunks, tf, dm_p)
    # b2_ref: (1, dm_p)
    # o_ref:  (tm, dm_p)
    n_chunks = w1_ref.shape[0]
    x = x_ref[...]

    def chunk(k, acc):
        h = jnp.dot(x, w1_ref[k], preferred_element_type=jnp.float32)
        h = jnp.maximum(h + b1_ref[k].astype(jnp.float32), 0.0)
        return acc + jnp.dot(h.astype(w2_ref.dtype), w2_ref[k],
                             preferred_element_type=jnp.float32)

    acc0 = jnp.zeros((x_ref.shape[0], o_ref.shape[1]), jnp.float32)
    if n_chunks == 1:
        acc = chunk(0, acc0)
    else:
        acc = lax.fori_loop(0, n_chunks, chunk, acc0, unroll=n_chunks <= 8)

    o_ref[...] = (acc + b2_ref[...].astype(jnp.float32)).astype(o_ref.dtype)


def _ffn_chunked_kernel(x_ref, w1_ref, b1_ref, w2_ref, b2_ref, o_ref, acc_ref):
    # Fallback when weights do not fit VMEM: grid = (row tiles, d_ff chunks),
    # f32 VMEM accumulator persistent across the (arbitrary) k axis.
    k = pl.program_id(1)

    @pl.when(k == 0)
    def _():
        acc_ref[...] = jnp.zeros_like(acc_ref)

    h = jnp.dot(x_ref[...], w1_ref[...], preferred_element_type=jnp.float32)
    h = jnp.maximum(h + b1_ref[...].astype(jnp.float32), 0.0)
    acc_ref[...] += jnp.dot(h.astype(w2_ref.dtype), w2_ref[...],
                            preferred_element_type=jnp.float32)

    @pl.when(k == pl.num_programs(1) - 1)
    def _():
        o_ref[...] = (acc_ref[...]
                      + b2_ref[...].astype(jnp.float32)).astype(o_ref.dtype)


# --------------------------------------------------------------------------
# Wrapper
# --------------------------------------------------------------------------
@functools.partial(
    jax.jit, static_argnames=("tm", "tf", "compute_dtype", "weights_resident"))
def ffn_pallas(x, w1, b1, w2, b2, *, tm=512, tf=512,
               compute_dtype=jnp.bfloat16, weights_resident=None):
    """x: (..., d_model). Returns same shape and dtype as x.

    compute_dtype: operand dtype for the matmuls (default bf16; accumulation
    stays f32).  weights_resident: None = auto (based on VMEM budget),
    True/False = force resident / chunked path.
    """
    orig_shape = x.shape
    out_dtype = x.dtype
    d_model = orig_shape[-1]
    d_ff = w1.shape[1]

    x2d = x.reshape(-1, d_model)
    m = x2d.shape[0]

    cdt = jnp.dtype(compute_dtype) if compute_dtype is not None else jnp.dtype(x.dtype)
    itm = cdt.itemsize
    out_itm = jnp.dtype(out_dtype).itemsize
    row_align = 16 if itm < 4 else 8        # bf16 native sublane tile is 16

    # ---- tile geometry ----------------------------------------------------
    dm_p = _lane_pad(d_model)
    ff_lane = _lane_pad(d_ff)
    tf_eff = max(128, min(_round_up(tf, 128), ff_lane))
    ff_p = _round_up(ff_lane, tf_eff)
    n_chunks = ff_p // tf_eff

    tm_eff = min(_round_up(tm, row_align), _round_up(m, row_align))
    # keep >=2 row tiles when there is enough work (megacore sharding on v7x)
    if m >= 256 and _round_up(m, tm_eff) // tm_eff < 2:
        tm_eff = _round_up(_cdiv(m, 2), row_align)

    # ---- VMEM budget & path selection --------------------------------------
    vmem_limit = int(_physical_vmem_bytes() * 0.85)

    w_bytes = itm * (2 * dm_p * ff_p + ff_p + dm_p)          # W1+W2+b1+b2
    resident_bytes = (2 * w_bytes                             # (allow 2x buffers)
                      + 2 * tm_eff * dm_p * itm               # x tile (dbl-buf)
                      + 2 * tm_eff * dm_p * out_itm           # out tile (dbl-buf)
                      + 4 * tm_eff * (tf_eff + dm_p)          # f32 h chunk + acc
                      + itm * tm_eff * tf_eff)                # h cast for fc_2
    if weights_resident is None:
        use_resident = resident_bytes <= int(0.75 * vmem_limit)
    else:
        use_resident = bool(weights_resident)

    if not use_resident:
        # shrink the row tile until the chunked working set fits comfortably
        def chunked_bytes(tm_):
            return (2 * itm * (tm_ * dm_p + dm_p * tf_eff + tf_eff
                               + tf_eff * dm_p + dm_p)
                    + 2 * out_itm * tm_ * dm_p
                    + 4 * tm_ * dm_p                       # f32 accumulator
                    + 4 * tm_ * tf_eff                     # f32 h
                    + itm * tm_ * tf_eff)                  # h cast
        while chunked_bytes(tm_eff) > int(0.8 * vmem_limit) and tm_eff > 2 * row_align:
            tm_eff = max(row_align, _round_up(tm_eff // 2, row_align))

    m_p = _round_up(m, tm_eff)
    n_row_tiles = m_p // tm_eff

    # ---- cast + pad (padding skipped when already aligned) ------------------
    def _cast(a):
        return a if a.dtype == cdt else a.astype(cdt)

    def _pad2d(a, rows, cols):
        if a.shape == (rows, cols):
            return a
        return jnp.zeros((rows, cols), a.dtype).at[:a.shape[0], :a.shape[1]].set(a)

    xp = _pad2d(_cast(x2d), m_p, dm_p)
    w1p = _pad2d(_cast(w1), dm_p, ff_p)
    b1p = _pad2d(_cast(b1.reshape(1, d_ff)), 1, ff_p)
    w2p = _pad2d(_cast(w2), ff_p, dm_p)
    b2p = _pad2d(_cast(b2.reshape(1, d_model)), 1, dm_p)

    # ---- honest cost estimate ----------------------------------------------
    flops = 4 * m_p * dm_p * ff_p                     # two matmuls
    weight_reads = 1 if use_resident else n_row_tiles
    bytes_accessed = (itm * m_p * dm_p + out_itm * m_p * dm_p
                      + weight_reads * itm * (2 * dm_p * ff_p + ff_p + dm_p))
    cost = pl.CostEstimate(flops=int(flops), transcendentals=0,
                           bytes_accessed=int(bytes_accessed))

    if use_resident:
        # Re-lay weights with the d_ff chunk axis leading so the kernel only
        # needs (safe) leading-dim dynamic indexing of the resident buffers.
        w1r = w1p.reshape(dm_p, n_chunks, tf_eff).transpose(1, 0, 2)
        b1r = b1p.reshape(n_chunks, 1, tf_eff)
        w2r = w2p.reshape(n_chunks, tf_eff, dm_p)

        out = pl.pallas_call(
            _ffn_resident_kernel,
            out_shape=jax.ShapeDtypeStruct((m_p, dm_p), out_dtype),
            grid_spec=pltpu.PrefetchScalarGridSpec(
                num_scalar_prefetch=0,
                grid=(n_row_tiles,),
                in_specs=[
                    pl.BlockSpec((tm_eff, dm_p), lambda i: (i, 0)),            # x rows
                    pl.BlockSpec((n_chunks, dm_p, tf_eff), lambda i: (0, 0, 0)),  # W1 resident
                    pl.BlockSpec((n_chunks, 1, tf_eff), lambda i: (0, 0, 0)),     # b1 resident
                    pl.BlockSpec((n_chunks, tf_eff, dm_p), lambda i: (0, 0, 0)),  # W2 resident
                    pl.BlockSpec((1, dm_p), lambda i: (0, 0)),                    # b2
                ],
                out_specs=pl.BlockSpec((tm_eff, dm_p), lambda i: (i, 0)),
            ),
            compiler_params=pltpu.CompilerParams(
                dimension_semantics=("parallel",),
                vmem_limit_bytes=vmem_limit),
            cost_estimate=cost,
        )(xp, w1r, b1r, w2r, b2p)
    else:
        out = pl.pallas_call(
            _ffn_chunked_kernel,
            out_shape=jax.ShapeDtypeStruct((m_p, dm_p), out_dtype),
            grid_spec=pltpu.PrefetchScalarGridSpec(
                num_scalar_prefetch=0,
                grid=(n_row_tiles, n_chunks),
                in_specs=[
                    pl.BlockSpec((tm_eff, dm_p), lambda i, k: (i, 0)),   # x rows
                    pl.BlockSpec((dm_p, tf_eff), lambda i, k: (0, k)),   # W1 chunk
                    pl.BlockSpec((1, tf_eff), lambda i, k: (0, k)),      # b1 chunk
                    pl.BlockSpec((tf_eff, dm_p), lambda i, k: (k, 0)),   # W2 chunk
                    pl.BlockSpec((1, dm_p), lambda i, k: (0, 0)),        # b2
                ],
                out_specs=pl.BlockSpec((tm_eff, dm_p), lambda i, k: (i, 0)),
                scratch_shapes=[pltpu.VMEM((tm_eff, dm_p), jnp.float32)],
            ),
            compiler_params=pltpu.CompilerParams(
                dimension_semantics=("parallel", "arbitrary"),
                vmem_limit_bytes=vmem_limit),
            cost_estimate=cost,
        )(xp, w1p, b1p, w2p, b2p)

    return out[:m, :d_model].reshape(orig_shape)


# --------------------------------------------------------------------------
# Parameter init (mimics nn.Linear's U(-1/sqrt(fan_in), +1/sqrt(fan_in)))
# --------------------------------------------------------------------------
def init_ffn_params(key, d_model, d_ff, dtype=jnp.float32):
    k1, k2, k3, k4 = jax.random.split(key, 4)
    bound1 = 1.0 / jnp.sqrt(d_model)
    bound2 = 1.0 / jnp.sqrt(d_ff)
    w1 = jax.random.uniform(k1, (d_model, d_ff), dtype, -bound1, bound1)
    b1 = jax.random.uniform(k2, (1, d_ff), dtype, -bound1, bound1)
    w2 = jax.random.uniform(k3, (d_ff, d_model), dtype, -bound2, bound2)
    b2 = jax.random.uniform(k4, (1, d_model), dtype, -bound2, bound2)
    return w1, b1, w2, b2


def _ref_ffn(x, w1, b1, w2, b2):
    d_model = x.shape[-1]
    h = jnp.maximum(x.reshape(-1, d_model) @ w1 + b1, 0.0)
    return (h @ w2 + b2).reshape(x.shape)


if __name__ == "__main__":
    key = jax.random.PRNGKey(0)
    k1, k2, k3, k4 = jax.random.split(key, 4)

    # --- test 1: small module-consistent shapes (resident path, 1 chunk) ---
    batch, seq, d_model, d_ff = 2, 8, 32, 64
    x = jax.random.normal(k1, (batch, seq, d_model), jnp.float32)
    params = init_ffn_params(k2, d_model, d_ff)
    y = jax.block_until_ready(ffn_pallas(x, *params))
    ref = _ref_ffn(x, *params)
    assert y.shape == x.shape and y.dtype == x.dtype
    assert jnp.allclose(y, ref, atol=3e-2, rtol=3e-2)

    # --- test 2: multiple row tiles + in-kernel d_ff chunk loop ------------
    batch2, seq2, d_model2, d_ff2 = 2, 128, 128, 512
    x2 = jax.random.normal(k3, (batch2, seq2, d_model2), jnp.float32)
    params2 = init_ffn_params(k4, d_model2, d_ff2)
    y2 = jax.block_until_ready(ffn_pallas(x2, *params2, tf=128))
    ref2 = _ref_ffn(x2, *params2)
    assert jnp.allclose(y2, ref2, atol=5e-2, rtol=5e-2)

    # --- test 3: force the chunked (weights-streamed) fallback path --------
    y3 = jax.block_until_ready(
        ffn_pallas(x2, *params2, tm=128, tf=128, weights_resident=False))
    assert jnp.allclose(y3, ref2, atol=5e-2, rtol=5e-2)

    print("KERNEL_OK")
</pallas_src>

<mosaic_0001>
module attributes {stable_mosaic.version = 11 : i64} {
  func.func @_ffn_resident_kernel(%arg0: i32, %arg1: memref<16x128xbf16, #tpu.memory_space<vmem>>, %arg2: memref<1x128x128xbf16, #tpu.memory_space<vmem>>, %arg3: memref<1x1x128xbf16, #tpu.memory_space<vmem>>, %arg4: memref<1x128x128xbf16, #tpu.memory_space<vmem>>, %arg5: memref<1x128xbf16, #tpu.memory_space<vmem>>, %arg6: memref<16x128xf32, #tpu.memory_space<vmem>>) attributes {dimension_semantics = [#tpu.dimension_semantics<parallel>], iteration_bounds = array<i64: 1>, scalar_prefetch = 0 : i64, scratch_operands = 0 : i64, tpu.core_type = #tpu.core_type<tc>, window_params = [{transform_indices = @transform_0, window_bounds = array<i64: 16, 128>}, {pipeline_mode = #tpu.pipeline_mode<synchronous>, transform_indices = @transform_1, window_bounds = array<i64: 1, 128, 128>}, {pipeline_mode = #tpu.pipeline_mode<synchronous>, transform_indices = @transform_2, window_bounds = array<i64: 1, 1, 128>}, {pipeline_mode = #tpu.pipeline_mode<synchronous>, transform_indices = @transform_3, window_bounds = array<i64: 1, 128, 128>}, {pipeline_mode = #tpu.pipeline_mode<synchronous>, transform_indices = @transform_4, window_bounds = array<i64: 1, 128>}, {transform_indices = @transform_5, window_bounds = array<i64: 16, 128>}]} {
    %c0 = arith.constant 0 : index
    %c0_0 = arith.constant 0 : index
    %0 = vector.load %arg1[%c0, %c0_0] : memref<16x128xbf16, #tpu.memory_space<vmem>>, vector<16x128xbf16>
    %cst = arith.constant 0.000000e+00 : f32
    %1 = vector.broadcast %cst : f32 to vector<16x128xf32>
    %c0_1 = arith.constant 0 : index
    %c0_2 = arith.constant 0 : index
    %c0_3 = arith.constant 0 : index
    %2 = vector.load %arg2[%c0_1, %c0_2, %c0_3] : memref<1x128x128xbf16, #tpu.memory_space<vmem>>, vector<1x128x128xbf16>
    %3 = vector.shape_cast %2 : vector<1x128x128xbf16> to vector<128x128xbf16>
    %cst_4 = arith.constant dense<0.000000e+00> : vector<16x128xf32>
    %4 = tpu.matmul %0, %3, %cst_4 {dimension_numbers = #tpu.dot_dimension_numbers<[1], [0], [0], [1], [0, 0, 1, 1], [], []>} : vector<16x128xbf16>, vector<128x128xbf16>, vector<16x128xf32> -> vector<16x128xf32>
    %c0_5 = arith.constant 0 : index
    %c0_6 = arith.constant 0 : index
    %c0_7 = arith.constant 0 : index
    %5 = vector.load %arg3[%c0_5, %c0_6, %c0_7] : memref<1x1x128xbf16, #tpu.memory_space<vmem>>, vector<1x1x128xbf16>
    %6 = vector.shape_cast %5 : vector<1x1x128xbf16> to vector<1x128xbf16>
    %7 = arith.extf %6 : vector<1x128xbf16> to vector<1x128xf32>
    %8 = vector.broadcast %7 : vector<1x128xf32> to vector<16x128xf32>
    %9 = arith.addf %4, %8 : vector<16x128xf32>
    %cst_8 = arith.constant 0.000000e+00 : f32
    %10 = vector.broadcast %cst_8 : f32 to vector<16x128xf32>
    %11 = arith.maximumf %9, %10 : vector<16x128xf32>
    %12 = arith.truncf %11 : vector<16x128xf32> to vector<16x128xbf16>
    %c0_9 = arith.constant 0 : index
    %c0_10 = arith.constant 0 : index
    %c0_11 = arith.constant 0 : index
    %13 = vector.load %arg4[%c0_9, %c0_10, %c0_11] : memref<1x128x128xbf16, #tpu.memory_space<vmem>>, vector<1x128x128xbf16>
    %14 = vector.shape_cast %13 : vector<1x128x128xbf16> to vector<128x128xbf16>
    %cst_12 = arith.constant dense<0.000000e+00> : vector<16x128xf32>
    %15 = tpu.matmul %12, %14, %cst_12 {dimension_numbers = #tpu.dot_dimension_numbers<[1], [0], [0], [1], [0, 0, 1, 1], [], []>} : vector<16x128xbf16>, vector<128x128xbf16>, vector<16x128xf32> -> vector<16x128xf32>
    %16 = arith.addf %1, %15 : vector<16x128xf32>
    %c0_13 = arith.constant 0 : index
    %c0_14 = arith.constant 0 : index
    %17 = vector.load %arg5[%c0_13, %c0_14] : memref<1x128xbf16, #tpu.memory_space<vmem>>, vector<1x128xbf16>
    %18 = arith.extf %17 : vector<1x128xbf16> to vector<1x128xf32>
    %19 = vector.broadcast %18 : vector<1x128xf32> to vector<16x128xf32>
    %20 = arith.addf %16, %19 : vector<16x128xf32>
    %c0_15 = arith.constant 0 : index
    %c0_16 = arith.constant 0 : index
    %21 = vector.load %arg6[%c0_15, %c0_16] : memref<16x128xf32, #tpu.memory_space<vmem>>, vector<16x128xf32>
    tpu.vector_store %arg6[%c0_15, %c0_16], %20 {strides = array<i32>} : memref<16x128xf32, #tpu.memory_space<vmem>>, vector<16x128xf32>,
    return
  }
  func.func @transform_0(%arg0: i32) -> (i32, i32) {
    %c0_i32 = arith.constant 0 : i32
    %c0_i32_0 = arith.constant 0 : i32
    return %arg0, %c0_i32 : i32, i32
  }
  func.func @transform_1(%arg0: i32) -> (i32, i32, i32) {
    %c0_i32 = arith.constant 0 : i32
    %c0_i32_0 = arith.constant 0 : i32
    %c0_i32_1 = arith.constant 0 : i32
    %c0_i32_2 = arith.constant 0 : i32
    return %c0_i32, %c0_i32_0, %c0_i32_1 : i32, i32, i32
  }
  func.func @transform_2(%arg0: i32) -> (i32, i32, i32) {
    %c0_i32 = arith.constant 0 : i32
    %c0_i32_0 = arith.constant 0 : i32
    %c0_i32_1 = arith.constant 0 : i32
    %c0_i32_2 = arith.constant 0 : i32
    return %c0_i32, %c0_i32_0, %c0_i32_1 : i32, i32, i32
  }
  func.func @transform_3(%arg0: i32) -> (i32, i32, i32) {
    %c0_i32 = arith.constant 0 : i32
    %c0_i32_0 = arith.constant 0 : i32
    %c0_i32_1 = arith.constant 0 : i32
    %c0_i32_2 = arith.constant 0 : i32
    return %c0_i32, %c0_i32_0, %c0_i32_1 : i32, i32, i32
  }
  func.func @transform_4(%arg0: i32) -> (i32, i32) {
    %c0_i32 = arith.constant 0 : i32
    %c0_i32_0 = arith.constant 0 : i32
    %c0_i32_1 = arith.constant 0 : i32
    return %c0_i32, %c0_i32_0 : i32, i32
  }
  func.func @transform_5(%arg0: i32) -> (i32, i32) {
    %c0_i32 = arith.constant 0 : i32
    %c0_i32_0 = arith.constant 0 : i32
    return %arg0, %c0_i32 : i32, i32
  }
}

</mosaic_0001>

<bundles_post_ra>
// kernel: ffn_pallas.1
= control target key start
LH: loop header
LB: loop body
LE: loop exit
PB: predicated region body
PF: predicated region fallthrough
CT: control target
= control target key end

     0   :  { %s377_s1 = inlined_call_operand.vmem [shape: bf16[1,128,128], index: 1, kind: input, shape index: {}]   ;;  %s378_s3 = inlined_call_operand.vmem [shape: bf16[1,128,128], index: 3, kind: input, shape index: {}]   ;;  %s379_s0 = inlined_call_operand.vmem [shape: bf16[16,128], index: 0, kind: input, shape index: {}]   ;;  %s380_s2 = inlined_call_operand.vmem [shape: bf16[1,1,128], index: 2, kind: input, shape index: {}]   ;;  %s381_s4 = inlined_call_operand.vmem [shape: bf16[1,128], index: 4, kind: input, shape index: {}]   ;;  %s382_s5 = inlined_call_operand.vmem [shape: f32[16,128], index: 5, kind: output, shape index: {}]  }
   0x1   :  { %v275_v0 = vld [vmem:[%s377_s1 + $0x38] sm:$0xff]  ;;  %v274_v1 = vld [vmem:[%s377_s1 + $0x30] sm:$0xff]  ;;  %v273_v4 = vld [vmem:[%s377_s1 + $0x28] sm:$0xff] }
   0x2   :  { %95 = vmatpush.bf16.msra.mxu0 %v275_v0  ;;  %v283_v2 = vld [vmem:[%s378_s3 + $0x38] sm:$0xff]  ;;  %v282_v3 = vld [vmem:[%s378_s3 + $0x30] sm:$0xff]  ;;  %v281_v5 = vld [vmem:[%s378_s3 + $0x28] sm:$0xff] }
   0x3   :  { %179 = vmatpush.bf16.msra.mxu1 %v283_v2  ;;  %v272_v6 = vld [vmem:[%s377_s1 + $0x20] sm:$0xff]  ;;  %v271_v8 = vld [vmem:[%s377_s1 + $0x18] sm:$0xff]  ;;  %v270_v9 = vld [vmem:[%s377_s1 + $0x10] sm:$0xff] }
   0x4   :  { %v280_v7 = vld [vmem:[%s378_s3 + $0x20] sm:$0xff]  ;;  %v269_v10 = vld [vmem:[%s377_s1 + $0x8] sm:$0xff]  ;;  %v279_v13 = vld [vmem:[%s378_s3 + $0x18] sm:$0xff] }
   0x5   :  { %v268_v11 = vld [vmem:[%s377_s1] sm:$0xff]  ;;  %v278_v14 = vld [vmem:[%s378_s3 + $0x10] sm:$0xff]  ;;  %v277_v15 = vld [vmem:[%s378_s3 + $0x8] sm:$0xff] }
   0x6   :  { %96 = vmatpush.bf16.msra.mxu0 %v274_v1  ;;  %v267_v12 = vld [vmem:[%s379_s0] sm:$0xff] }
   0x7   :  { %180 = vmatpush.bf16.msra.mxu1 %v282_v3  ;;  %v276_v16 = vld [vmem:[%s378_s3] sm:$0xff] }
   0x8   :  { %v38_v17 = vld [vmem:[%s380_s2] sm:$0x1] }
   0x9   :  { %v39_v18 = vunpack.c.l.bf16 %v38_v17  ;;  %v128_v27 = vld [vmem:[%s381_s4] sm:$0x1] }
   0xa   :  { %97 = vmatpush.bf16.msra.mxu0 %v273_v4  ;;  %v129_v28 = vunpack.c.l.bf16 %v128_v27 }
   0xb   :  { %181 = vmatpush.bf16.msra.mxu1 %v281_v5  ;;  %v40_v20 = vperm.slane %v39_v18, 0 }
   0xc   :  { %v130_v29 = vperm.slane %v129_v28, 0 }
   0xe   :  { %98 = vmatpush.bf16.msra.mxu0 %v272_v6 }
   0xf   :  { %182 = vmatpush.bf16.msra.mxu1 %v280_v7 }
  0x12   :  { %99 = vmatpush.bf16.msra.mxu0 %v271_v8 }
  0x13   :  { %183 = vmatpush.bf16.msra.mxu1 %v279_v13 }
  0x16   :  { %100 = vmatpush.bf16.msra.mxu0 %v270_v9 }
  0x17   :  { %184 = vmatpush.bf16.msra.mxu1 %v278_v14 }
  0x1a   :  { %101 = vmatpush.bf16.msra.mxu0 %v269_v10 }
  0x1b   :  { %185 = vmatpush.bf16.msra.mxu1 %v277_v15 }
  0x1e   :  { %102 = vmatpush.bf16.msra.mxu0 %v268_v11 }
  0x1f   :  { %186 = vmatpush.bf16.msra.mxu1 %v276_v16 }
  0x21   :  { %103 = vmatmul.bf16.vlgmr.msra.gmra.mxu0 %v267_v12 }
  0x9e   :  { %v104_v19 = vpop.f32.mrf.mxu0 }
  0x9f   :  { %v105_v21 = vadd.f32 %v104_v19, %v40_v20 }
  0xa1   :  { %v109_v24 = vmax.f32 %v105_v21, 0.0 }
  0xa6   :  { %v106_v22 = vpop.f32.mrf.mxu0 }
  0xa7   :  { %v107_v23 = vadd.f32 %v106_v22, %v40_v20 }
  0xa9   :  { %v110_v25 = vmax.f32 %v107_v23, 0.0 }
  0xab   :  { %v111_v26 = vpack.c.bf16 %v110_v25, %v109_v24 }
  0xad   :  { %187 = vmatmul.bf16.vlgmr.msra.gmra.mxu1 %v111_v26 }
 0x12a   :  { %v188_v30 = vpop.f32.mrf.mxu1 }
 0x12b   :  { %v189_v31 = vadd.f32 %v188_v30, %v130_v29 }
 0x12d   :  { %193 = vst [vmem:[%s382_s5] sm:$0xff] %v189_v31 }
 0x132   :  { %v190_v32 = vpop.f32.mrf.mxu1 }
 0x133   :  { %v191_v33 = vadd.f32 %v190_v32, %v130_v29 }
 0x135   :  { %194 = vst [vmem:[%s382_s5 + $0x8] sm:$0xff] %v191_v33 }

</bundles_post_ra>
